<compile_context>
chip_gen: v7x
topology: tpu7x:2x2x1
jax: 0.10.0
libtpu: 0.0.40
codegen_flags: <defaults>
</compile_context>

<pallas_src>
import jax
import jax.numpy as jnp
from jax.experimental import pallas as pl
from jax.experimental.pallas import tpu as pltpu


def _maga_loss_kernel(x2_ref, dec_ref, z_ref, zr_ref,
                      mu1_ref, lv1_ref, mu2_ref, lv2_ref,
                      recon_ref, kl_ref, l1_ref, acc_ref):
    k = pl.program_id(1)  # feature-tile index (reduction axis, innermost)

    @pl.when(k == 0)
    def _init_and_latents():
        # Reset the streaming BCE accumulator for this batch tile.
        acc_ref[...] = jnp.zeros_like(acc_ref)

        # ---- KL-style loss between the two Gaussians (tiny, once per tile) ----
        mu_z = mu2_ref[...].astype(jnp.float32) - mu1_ref[...].astype(jnp.float32)
        var_z = (jnp.exp(lv1_ref[...].astype(jnp.float32))
                 + jnp.exp(lv2_ref[...].astype(jnp.float32)))
        var_z = jnp.clip(var_z, -2.0, 20.0)
        logvar_z = jnp.log(var_z)
        kl_ref[...] = -0.5 * jnp.sum(1.0 + logvar_z - mu_z * mu_z - var_z,
                                     axis=1, keepdims=True)          # (TB, 1)

        # ---- latent reconstruction loss: L1 over latent dim ----
        l1_ref[...] = jnp.sum(
            jnp.abs(zr_ref[...].astype(jnp.float32)
                    - z_ref[...].astype(jnp.float32)),
            axis=1, keepdims=True)                                    # (TB, 1)

    # ---- streaming binary cross entropy over the feature axis ----
    x2 = x2_ref[...].astype(jnp.float32)      # targets in [0, 1]
    dec = dec_ref[...].astype(jnp.float32)    # probabilities in (0, 1)
    # PyTorch's binary_cross_entropy clamps the log terms at -100; clamp BEFORE
    # the multiply so 0 * (-100) == 0 (never 0 * -inf).
    # (If logits were available upstream, a single-softplus BCE-with-logits
    # would halve the transcendental count — relevant on v5e's single EUP.)
    log_p = jnp.maximum(jnp.log(dec), -100.0)
    log_1mp = jnp.maximum(jnp.log(1.0 - dec), -100.0)
    acc_ref[...] = acc_ref[...] - (x2 * log_p + (1.0 - x2) * log_1mp)

    @pl.when(k == pl.num_programs(1) - 1)
    def _finish():
        # Single cross-lane reduction per batch tile (off the per-step path).
        recon_ref[...] = jnp.sum(acc_ref[...], axis=1, keepdims=True)  # (TB, 1)


def _pick_batch_tile(batch, min_itemsize):
    """Largest power-of-two batch tile (<=128) that divides B and respects the
    sublane packing of the narrowest input dtype; else the whole batch."""
    if min_itemsize >= 4:
        min_tb = 8
    elif min_itemsize == 2:
        min_tb = 16
    else:
        min_tb = 32
    if batch % min_tb != 0:
        return batch
    tb = min_tb
    while tb * 2 <= 128 and batch % (tb * 2) == 0:
        tb *= 2
    return tb


def maga_loss(x2, z, mu1, logvar1, mu2, logvar2, decoded_x2, z_recon,
              *, beta_kl=0.5, beta_recon=1.0):
    """Returns (total_loss, recon_loss, recon_latent_loss, kl_loss), scalars."""
    B = x2.shape[0]
    D = z.shape[1]

    # Keep the big image tensors in their native dtype (bf16 stays bf16);
    # the kernel upcasts to f32 after load.
    x2f = x2.reshape(B, -1)
    decf = decoded_x2.reshape(B, -1)
    N = x2f.shape[1]

    # ---- feature-axis tiling (multiple of 128 lanes) ----
    TN_MAX = 2048
    n_pad128 = pl.cdiv(N, 128) * 128
    TN = min(TN_MAX, n_pad128)
    GN = pl.cdiv(N, TN)
    Npad = GN * TN
    if Npad != N:
        # Padding with (target=1, prob=1) contributes exactly 0 to the BCE sum.
        x2f = jnp.pad(x2f, ((0, 0), (0, Npad - N)), constant_values=1.0)
        decf = jnp.pad(decf, ((0, 0), (0, Npad - N)), constant_values=1.0)

    # ---- batch-axis tiling (parallel axis; shards across v7x's 2 TCs) ----
    min_item = min(a.dtype.itemsize for a in
                   (x2f, decf, z, z_recon, mu1, logvar1, mu2, logvar2))
    TB = _pick_batch_tile(B, min_item)
    GB = B // TB
    grid = (GB, GN)

    img_spec = pl.BlockSpec((TB, TN), lambda b, k: (b, k))
    lat_spec = pl.BlockSpec((TB, D), lambda b, k: (b, 0))
    out_spec = pl.BlockSpec((TB, 1), lambda b, k: (b, 0))

    # ---- VMEM budget: 2x double-buffered image tiles + f32 accumulator + small stuff ----
    img_bytes = 2 * TB * TN * (x2f.dtype.itemsize + decf.dtype.itemsize)
    acc_bytes = TB * TN * 4
    small_bytes = 2 * TB * (6 * D + 3) * 4
    vmem_limit = int(min(max(2 * (img_bytes + acc_bytes + small_bytes), 4 << 20),
                         32 << 20))

    cost = pl.CostEstimate(
        flops=int(8 * B * Npad + 12 * B * D),
        transcendentals=int(2 * B * Npad + 3 * B * D),
        bytes_accessed=int(x2f.size * x2f.dtype.itemsize
                           + decf.size * decf.dtype.itemsize
                           + 6 * B * D * 4 + 3 * B * 4),
    )

    recon, kl, l1 = pl.pallas_call(
        _maga_loss_kernel,
        grid=grid,
        in_specs=[img_spec, img_spec] + [lat_spec] * 6,
        out_specs=(out_spec, out_spec, out_spec),
        out_shape=(
            jax.ShapeDtypeStruct((B, 1), jnp.float32),
            jax.ShapeDtypeStruct((B, 1), jnp.float32),
            jax.ShapeDtypeStruct((B, 1), jnp.float32),
        ),
        scratch_shapes=[pltpu.VMEM((TB, TN), jnp.float32)],
        compiler_params=pltpu.CompilerParams(
            dimension_semantics=("parallel", "arbitrary"),
            vmem_limit_bytes=vmem_limit,
        ),
        cost_estimate=cost,
    )(x2f, decf, z, z_recon, mu1, logvar1, mu2, logvar2)

    recon = recon[:, 0]
    kl = kl[:, 0]
    l1 = l1[:, 0]
    total = recon + beta_kl * kl + beta_recon * l1
    return total.mean(), recon.mean(), l1.mean(), kl.mean()


def _reference(x2, z, mu1, logvar1, mu2, logvar2, decoded_x2, z_recon,
               beta_kl, beta_recon):
    B = x2.shape[0]
    x2f = x2.reshape(B, -1).astype(jnp.float32)
    decf = decoded_x2.reshape(B, -1).astype(jnp.float32)
    bce = -(x2f * jnp.maximum(jnp.log(decf), -100.0)
            + (1.0 - x2f) * jnp.maximum(jnp.log(1.0 - decf), -100.0))
    recon = bce.sum(axis=1)
    mu_z = mu2 - mu1
    var_z = jnp.clip(jnp.exp(logvar1) + jnp.exp(logvar2), -2.0, 20.0)
    kl = -0.5 * jnp.sum(1.0 + jnp.log(var_z) - mu_z ** 2 - var_z, axis=1)
    l1 = jnp.sum(jnp.abs(z_recon - z), axis=1)
    total = recon + beta_kl * kl + beta_recon * l1
    return total.mean(), recon.mean(), l1.mean(), kl.mean()


if __name__ == "__main__":
    key = jax.random.PRNGKey(0)
    B, C, H, W, D = 2, 4, 16, 16, 32
    beta_kl, beta_recon = 0.5, 1.0

    ks = jax.random.split(key, 8)
    x2 = jax.random.uniform(ks[0], (B, C, H, W), jnp.float32,
                            minval=0.0, maxval=1.0)
    decoded_x2 = jax.nn.sigmoid(jax.random.normal(ks[1], (B, C, H, W), jnp.float32))
    z = jax.random.normal(ks[2], (B, D), jnp.float32)
    z_recon = jax.random.normal(ks[3], (B, D), jnp.float32)
    mu1 = jax.random.normal(ks[4], (B, D), jnp.float32)
    logvar1 = 0.1 * jax.random.normal(ks[5], (B, D), jnp.float32)
    mu2 = jax.random.normal(ks[6], (B, D), jnp.float32)
    logvar2 = 0.1 * jax.random.normal(ks[7], (B, D), jnp.float32)

    out = maga_loss(x2, z, mu1, logvar1, mu2, logvar2, decoded_x2, z_recon,
                    beta_kl=beta_kl, beta_recon=beta_recon)
    out = jax.block_until_ready(out)

    ref = _reference(x2, z, mu1, logvar1, mu2, logvar2, decoded_x2, z_recon,
                     beta_kl, beta_recon)
    for o, r in zip(out, ref):
        assert jnp.allclose(o, r, rtol=1e-5, atol=1e-5), (o, r)

    print("KERNEL_OK")
</pallas_src>

<mosaic_0001>
module attributes {stable_mosaic.version = 11 : i64} {
  func.func @_maga_loss_kernel(%arg0: i32, %arg1: i32, %arg2: memref<2x1024xf32, #tpu.memory_space<vmem>>, %arg3: memref<2x1024xf32, #tpu.memory_space<vmem>>, %arg4: memref<2x32xf32, #tpu.memory_space<vmem>>, %arg5: memref<2x32xf32, #tpu.memory_space<vmem>>, %arg6: memref<2x32xf32, #tpu.memory_space<vmem>>, %arg7: memref<2x32xf32, #tpu.memory_space<vmem>>, %arg8: memref<2x32xf32, #tpu.memory_space<vmem>>, %arg9: memref<2x32xf32, #tpu.memory_space<vmem>>, %arg10: memref<2x1xf32, #tpu.memory_space<vmem>>, %arg11: memref<2x1xf32, #tpu.memory_space<vmem>>, %arg12: memref<2x1xf32, #tpu.memory_space<vmem>>, %arg13: memref<2x1024xf32, #tpu.memory_space<vmem>>) attributes {dimension_semantics = [#tpu.dimension_semantics<parallel>, #tpu.dimension_semantics<arbitrary>], iteration_bounds = array<i64: 1, 1>, scalar_prefetch = 0 : i64, scratch_operands = 1 : i64, tpu.core_type = #tpu.core_type<tc>, window_params = [{transform_indices = @transform_0, window_bounds = array<i64: 2, 1024>}, {transform_indices = @transform_1, window_bounds = array<i64: 2, 1024>}, {transform_indices = @transform_2, window_bounds = array<i64: 2, 32>}, {transform_indices = @transform_3, window_bounds = array<i64: 2, 32>}, {transform_indices = @transform_4, window_bounds = array<i64: 2, 32>}, {transform_indices = @transform_5, window_bounds = array<i64: 2, 32>}, {transform_indices = @transform_6, window_bounds = array<i64: 2, 32>}, {transform_indices = @transform_7, window_bounds = array<i64: 2, 32>}, {transform_indices = @transform_8, window_bounds = array<i64: 2, 1>}, {transform_indices = @transform_9, window_bounds = array<i64: 2, 1>}, {transform_indices = @transform_10, window_bounds = array<i64: 2, 1>}]} {
    %c0_i32 = arith.constant 0 : i32
    %0 = arith.cmpi eq, %arg1, %c0_i32 : i32
    %1 = arith.extui %0 : i1 to i32
    %c0_i32_0 = arith.constant 0 : i32
    %2 = arith.cmpi ne, %1, %c0_i32_0 : i32
    scf.if %2 {
      %cst_13 = arith.constant 0.000000e+00 : f32
      %24 = vector.broadcast %cst_13 : f32 to vector<2x1024xf32>
      %c0_14 = arith.constant 0 : index
      %c0_15 = arith.constant 0 : index
      %25 = vector.load %arg13[%c0_14, %c0_15] : memref<2x1024xf32, #tpu.memory_space<vmem>>, vector<2x1024xf32>
      tpu.vector_store %arg13[%c0_14, %c0_15], %24 {strides = array<i32>} : memref<2x1024xf32, #tpu.memory_space<vmem>>, vector<2x1024xf32>,
      %c0_16 = arith.constant 0 : index
      %c0_17 = arith.constant 0 : index
      %26 = vector.load %arg8[%c0_16, %c0_17] : memref<2x32xf32, #tpu.memory_space<vmem>>, vector<2x32xf32>
      %c0_18 = arith.constant 0 : index
      %c0_19 = arith.constant 0 : index
      %27 = vector.load %arg6[%c0_18, %c0_19] : memref<2x32xf32, #tpu.memory_space<vmem>>, vector<2x32xf32>
      %28 = arith.subf %26, %27 : vector<2x32xf32>
      %c0_20 = arith.constant 0 : index
      %c0_21 = arith.constant 0 : index
      %29 = vector.load %arg7[%c0_20, %c0_21] : memref<2x32xf32, #tpu.memory_space<vmem>>, vector<2x32xf32>
      %30 = math.exp %29 : vector<2x32xf32>
      %c0_22 = arith.constant 0 : index
      %c0_23 = arith.constant 0 : index
      %31 = vector.load %arg9[%c0_22, %c0_23] : memref<2x32xf32, #tpu.memory_space<vmem>>, vector<2x32xf32>
      %32 = math.exp %31 : vector<2x32xf32>
      %33 = arith.addf %30, %32 : vector<2x32xf32>
      %cst_24 = arith.constant -2.000000e+00 : f32
      %cst_25 = arith.constant 2.000000e+01 : f32
      %34 = vector.broadcast %cst_24 : f32 to vector<2x32xf32>
      %35 = arith.maximumf %34, %33 : vector<2x32xf32>
      %36 = vector.broadcast %cst_25 : f32 to vector<2x32xf32>
      %37 = arith.minimumf %36, %35 : vector<2x32xf32>
      %38 = math.log %37 : vector<2x32xf32>
      %cst_26 = arith.constant 1.000000e+00 : f32
      %39 = vector.broadcast %cst_26 : f32 to vector<2x32xf32>
      %40 = arith.addf %39, %38 : vector<2x32xf32>
      %41 = arith.mulf %28, %28 : vector<2x32xf32>
      %42 = arith.subf %40, %41 : vector<2x32xf32>
      %43 = arith.subf %42, %37 : vector<2x32xf32>
      %cst_27 = arith.constant dense<0.000000e+00> : vector<2xf32>
      %44 = vector.multi_reduction <add>, %43, %cst_27 [1] : vector<2x32xf32> to vector<2xf32>
      %45 = vector.shape_cast %44 : vector<2xf32> to vector<2x1xf32>
      %cst_28 = arith.constant -5.000000e-01 : f32
      %46 = vector.broadcast %cst_28 : f32 to vector<2x1xf32>
      %47 = arith.mulf %46, %45 : vector<2x1xf32>
      %c0_29 = arith.constant 0 : index
      %c0_30 = arith.constant 0 : index
      %48 = vector.load %arg11[%c0_29, %c0_30] : memref<2x1xf32, #tpu.memory_space<vmem>>, vector<2x1xf32>
      tpu.vector_store %arg11[%c0_29, %c0_30], %47 {strides = array<i32>} : memref<2x1xf32, #tpu.memory_space<vmem>>, vector<2x1xf32>,
      %c0_31 = arith.constant 0 : index
      %c0_32 = arith.constant 0 : index
      %49 = vector.load %arg5[%c0_31, %c0_32] : memref<2x32xf32, #tpu.memory_space<vmem>>, vector<2x32xf32>
      %c0_33 = arith.constant 0 : index
      %c0_34 = arith.constant 0 : index
      %50 = vector.load %arg4[%c0_33, %c0_34] : memref<2x32xf32, #tpu.memory_space<vmem>>, vector<2x32xf32>
      %51 = arith.subf %49, %50 : vector<2x32xf32>
      %52 = math.absf %51 : vector<2x32xf32>
      %cst_35 = arith.constant dense<0.000000e+00> : vector<2xf32>
      %53 = vector.multi_reduction <add>, %52, %cst_35 [1] : vector<2x32xf32> to vector<2xf32>
      %54 = vector.shape_cast %53 : vector<2xf32> to vector<2x1xf32>
      %c0_36 = arith.constant 0 : index
      %c0_37 = arith.constant 0 : index
      %55 = vector.load %arg12[%c0_36, %c0_37] : memref<2x1xf32, #tpu.memory_space<vmem>>, vector<2x1xf32>
      tpu.vector_store %arg12[%c0_36, %c0_37], %54 {strides = array<i32>} : memref<2x1xf32, #tpu.memory_space<vmem>>, vector<2x1xf32>,
    } else {
    }
    %c0 = arith.constant 0 : index
    %c0_1 = arith.constant 0 : index
    %3 = vector.load %arg2[%c0, %c0_1] : memref<2x1024xf32, #tpu.memory_space<vmem>>, vector<2x1024xf32>
    %c0_2 = arith.constant 0 : index
    %c0_3 = arith.constant 0 : index
    %4 = vector.load %arg3[%c0_2, %c0_3] : memref<2x1024xf32, #tpu.memory_space<vmem>>, vector<2x1024xf32>
    %5 = math.log %4 : vector<2x1024xf32>
    %cst = arith.constant -1.000000e+02 : f32
    %6 = vector.broadcast %cst : f32 to vector<2x1024xf32>
    %7 = arith.maximumf %5, %6 : vector<2x1024xf32>
    %cst_4 = arith.constant 1.000000e+00 : f32
    %8 = vector.broadcast %cst_4 : f32 to vector<2x1024xf32>
    %9 = arith.subf %8, %4 : vector<2x1024xf32>
    %10 = math.log %9 : vector<2x1024xf32>
    %cst_5 = arith.constant -1.000000e+02 : f32
    %11 = vector.broadcast %cst_5 : f32 to vector<2x1024xf32>
    %12 = arith.maximumf %10, %11 : vector<2x1024xf32>
    %c0_6 = arith.constant 0 : index
    %c0_7 = arith.constant 0 : index
    %13 = vector.load %arg13[%c0_6, %c0_7] : memref<2x1024xf32, #tpu.memory_space<vmem>>, vector<2x1024xf32>
    %14 = arith.mulf %3, %7 : vector<2x1024xf32>
    %cst_8 = arith.constant 1.000000e+00 : f32
    %15 = vector.broadcast %cst_8 : f32 to vector<2x1024xf32>
    %16 = arith.subf %15, %3 : vector<2x1024xf32>
    %17 = arith.mulf %16, %12 : vector<2x1024xf32>
    %18 = arith.addf %14, %17 : vector<2x1024xf32>
    %19 = arith.subf %13, %18 : vector<2x1024xf32>
    %c0_9 = arith.constant 0 : index
    %c0_10 = arith.constant 0 : index
    %20 = vector.load %arg13[%c0_9, %c0_10] : memref<2x1024xf32, #tpu.memory_space<vmem>>, vector<2x1024xf32>
    tpu.vector_store %arg13[%c0_9, %c0_10], %19 {strides = array<i32>} : memref<2x1024xf32, #tpu.memory_space<vmem>>, vector<2x1024xf32>,
    %c0_i32_11 = arith.constant 0 : i32
    %21 = arith.cmpi eq, %arg1, %c0_i32_11 : i32
    %22 = arith.extui %21 : i1 to i32
    %c0_i32_12 = arith.constant 0 : i32
    %23 = arith.cmpi ne, %22, %c0_i32_12 : i32
    scf.if %23 {
      %c0_13 = arith.constant 0 : index
      %c0_14 = arith.constant 0 : index
      %24 = vector.load %arg13[%c0_13, %c0_14] : memref<2x1024xf32, #tpu.memory_space<vmem>>, vector<2x1024xf32>
      %cst_15 = arith.constant dense<0.000000e+00> : vector<2xf32>
      %25 = vector.multi_reduction <add>, %24, %cst_15 [1] : vector<2x1024xf32> to vector<2xf32>
      %26 = vector.shape_cast %25 : vector<2xf32> to vector<2x1xf32>
      %c0_16 = arith.constant 0 : index
      %c0_17 = arith.constant 0 : index
      %27 = vector.load %arg10[%c0_16, %c0_17] : memref<2x1xf32, #tpu.memory_space<vmem>>, vector<2x1xf32>
      tpu.vector_store %arg10[%c0_16, %c0_17], %26 {strides = array<i32>} : memref<2x1xf32, #tpu.memory_space<vmem>>, vector<2x1xf32>,
    } else {
    }
    return
  }
  func.func @transform_0(%arg0: i32, %arg1: i32) -> (i32, i32) {
    %c0_i32 = arith.constant 0 : i32
    return %arg0, %arg1 : i32, i32
  }
  func.func @transform_1(%arg0: i32, %arg1: i32) -> (i32, i32) {
    %c0_i32 = arith.constant 0 : i32
    return %arg0, %arg1 : i32, i32
  }
  func.func @transform_2(%arg0: i32, %arg1: i32) -> (i32, i32) {
    %c0_i32 = arith.constant 0 : i32
    %c0_i32_0 = arith.constant 0 : i32
    return %arg0, %c0_i32 : i32, i32
  }
  func.func @transform_3(%arg0: i32, %arg1: i32) -> (i32, i32) {
    %c0_i32 = arith.constant 0 : i32
    %c0_i32_0 = arith.constant 0 : i32
    return %arg0, %c0_i32 : i32, i32
  }
  func.func @transform_4(%arg0: i32, %arg1: i32) -> (i32, i32) {
    %c0_i32 = arith.constant 0 : i32
    %c0_i32_0 = arith.constant 0 : i32
    return %arg0, %c0_i32 : i32, i32
  }
  func.func @transform_5(%arg0: i32, %arg1: i32) -> (i32, i32) {
    %c0_i32 = arith.constant 0 : i32
    %c0_i32_0 = arith.constant 0 : i32
    return %arg0, %c0_i32 : i32, i32
  }
  func.func @transform_6(%arg0: i32, %arg1: i32) -> (i32, i32) {
    %c0_i32 = arith.constant 0 : i32
    %c0_i32_0 = arith.constant 0 : i32
    return %arg0, %c0_i32 : i32, i32
  }
  func.func @transform_7(%arg0: i32, %arg1: i32) -> (i32, i32) {
    %c0_i32 = arith.constant 0 : i32
    %c0_i32_0 = arith.constant 0 : i32
    return %arg0, %c0_i32 : i32, i32
  }
  func.func @transform_8(%arg0: i32, %arg1: i32) -> (i32, i32) {
    %c0_i32 = arith.constant 0 : i32
    %c0_i32_0 = arith.constant 0 : i32
    return %arg0, %c0_i32 : i32, i32
  }
  func.func @transform_9(%arg0: i32, %arg1: i32) -> (i32, i32) {
    %c0_i32 = arith.constant 0 : i32
    %c0_i32_0 = arith.constant 0 : i32
    return %arg0, %c0_i32 : i32, i32
  }
  func.func @transform_10(%arg0: i32, %arg1: i32) -> (i32, i32) {
    %c0_i32 = arith.constant 0 : i32
    %c0_i32_0 = arith.constant 0 : i32
    return %arg0, %c0_i32 : i32, i32
  }
}

</mosaic_0001>

<bundles_post_ra>
// kernel: tpu_custom_call.1
= control target key start
LH: loop header
LB: loop body
LE: loop exit
PB: predicated region body
PF: predicated region fallthrough
CT: control target
= control target key end

     0   :  { %16 = vsyncpa [#allocation4], 0  ;;  %s392_s0 = inlined_call_operand.hbm [shape: f32[2,1024], index: 0, kind: input, shape index: {}]   ;;  %s393_s1 = inlined_call_operand.hbm [shape: f32[2,1024], index: 1, kind: input, shape index: {}]   ;;  %s394_s2 = inlined_call_operand.vmem [shape: f32[2,32], index: 2, kind: input, shape index: {}]   ;;  %s395_s3 = inlined_call_operand.vmem [shape: f32[2,32], index: 3, kind: input, shape index: {}]   ;;  %s396_s4 = inlined_call_operand.vmem [shape: f32[2,32], index: 4, kind: input, shape index: {}]   ;;  %s397_s5 = inlined_call_operand.vmem [shape: f32[2,32], index: 5, kind: input, shape index: {}]   ;;  %s398_s6 = inlined_call_operand.vmem [shape: f32[2,32], index: 6, kind: input, shape index: {}]   ;;  %s399_s7 = inlined_call_operand.vmem [shape: f32[2,32], index: 7, kind: input, shape index: {}]   ;;  %s400_s8 = inlined_call_operand.vmem [shape: f32[2,1], index: 8, kind: output, shape index: {0}]   ;;  %s401_s9 = inlined_call_operand.vmem [shape: f32[2,1], index: 9, kind: output, shape index: {1}]   ;;  %s402_s10 = inlined_call_operand.vmem [shape: f32[2,1], index: 10, kind: output, shape index: {2}]  }
   0x1   :  { %17 = vsyncpa [#allocation6], 0  ;;  %s275_s13 = smov [#allocation3]   ;;  %s276_s15 = smov [#allocation5]  }
   0x2   :  { %s24_s14 = sshll.u32 %s275_s13, 4  ;;  %s34_s16 = sshll.u32 %s276_s15, 4  ;;  %s25_s14 = int_to_ptr.vmem [resolvable:$true] %s24_s14  ;;  %s35_s16 = int_to_ptr.vmem [resolvable:$true] %s34_s16 }
   0x3   :  { %s227_s19 = scalar_lea.hbm %s392_s0, 256 }
   0x4   :  { %p228_p0 = scmp.ne.s32.totalorder %s392_s0, %s227_s19  ;;  %p231_p1 = scmp.lt.u32.totalorder %s227_s19, %s392_s0 }
   0x6   :  { %p233_p2 = pnand %p231_p1, %p228_p0 }
   0x8   :  { %236 = shalt.err (!%p233_p2)
}
   0x9   :  { %s237_s24 = scalar_lea.vmem %s25_s14, 256  ;;  %p242_p4 = scmp.lt.s32.totalorder %s25_s14, %s25_s14 }
   0xa   :  { %p238_p3 = scmp.ne.s32.totalorder %s25_s14, %s237_s24  ;;  %p243_p5 = scmp.lt.s32.totalorder %s237_s24, %s237_s24 }
   0xc   :  { %p244_p6 = por %p243_p5, %p242_p4 }
   0xe   :  { %p245_p7 = pnand %p244_p6, %p238_p3 }
  0x10   :  { %248 = shalt.err (!%p245_p7)
}
  0x11   :  { %27 = dma.hbm_to_vmem [thread:$0]  %s392_s0, 256, %s25_s14, [#allocation4]  }
  0x12   :  { %s249_s29 = scalar_lea.hbm %s393_s1, 256 }
  0x13   :  { %p250_p8 = scmp.ne.s32.totalorder %s393_s1, %s249_s29  ;;  %p253_p9 = scmp.lt.u32.totalorder %s249_s29, %s393_s1 }
  0x15   :  { %p255_p10 = pnand %p253_p9, %p250_p8 }
  0x17   :  { %258 = shalt.err (!%p255_p10)
}
  0x18   :  { %s259_s15 = scalar_lea.vmem %s35_s16, 256  ;;  %p264_p12 = scmp.lt.s32.totalorder %s35_s16, %s35_s16 }
  0x19   :  { %p260_p11 = scmp.ne.s32.totalorder %s35_s16, %s259_s15  ;;  %p265_p13 = scmp.lt.s32.totalorder %s259_s15, %s259_s15 }
  0x1b   :  { %p266_p0 = por %p265_p13, %p264_p12 }
  0x1d   :  { %p267_p1 = pnand %p266_p0, %p260_p11 }
  0x1f   :  { %270 = shalt.err (!%p267_p1)
}
  0x20   :  { %37 = dma.hbm_to_vmem [thread:$0]  %s393_s1, 256, %s35_s16, [#allocation6]  }
  0x21   :  { %271 = dma.done.wait [#allocation4], 256  }
  0x22   :  { %272 = vsyncadd [#allocation4], 4294967040 }
  0x23   :  { %273 = dma.done.wait [#allocation6], 256  }
  0x24   :  { %274 = vsyncadd [#allocation6], 4294967040  ;;  %v65_v0 = vld [vmem:[%s397_s5] sm:$0x3]  ;;  %v97_v4 = vld [vmem:[#allocation5] sm:$0xff]  ;;  %v138_v18 = vlaneseq  ;;  %vm176_vm0 = vcmask 1041408  }
  0x25   :  { %v66_v1 = vmul.f32 1.442695, %v65_v0  ;;  %v68_v2 = vld [vmem:[%s399_s7] sm:$0x3]  ;;  %v98_v5 = vld [vmem:[#allocation5 + $0x8] sm:$0xff]  ;;  %v105_v6 = vsub.f32 1.0, %v97_v4 }
  0x26   :  { %v69_v3 = vmul.f32 1.442695, %v68_v2  ;;  %v106_v7 = vsub.f32 1.0, %v98_v5  ;;  %v95_v12 = vld [vmem:[#allocation3] sm:$0xff]  ;;  %v96_v14 = vld [vmem:[#allocation3 + $0x8] sm:$0xff]  ;;  %v139_v33 = vshrl.u32 %v138_v18, 7 }
  0x27   :  { %213 = vpow2.f32 %v66_v1  ;;  %v277_v16 = vmov 1983009808   ;;  %v117_v25 = vsub.f32 1.0, %v95_v12  ;;  %v118_v29 = vsub.f32 1.0, %v96_v14  ;;  %v62_v38 = vld [vmem:[%s398_s6] sm:$0x3] }
  0x28   :  { %215 = vpow2.f32 %v69_v3  ;;  %v136_v17 = vunpack.c.l.s4 %v277_v16  ;;  %v63_v39 = vld [vmem:[%s396_s4] sm:$0x3]  ;;  %vm80_vm1 = vcmask 254976   ;;  %vm85_vm2 = vcmask 1024  }
  0x29   :  { %217 = vlog2.f32 %v97_v4  ;;  %v64_v44 = vsub.f32 %v62_v38, %v63_v39  ;;  %v87_v53 = vld [vmem:[%s395_s3] sm:$0x3] }
  0x2a   :  { %219 = vlog2.f32 %v98_v5  ;;  %v137_v32 = vunpack.c.0.s8 %v136_v17  ;;  %v88_v54 = vld [vmem:[%s394_s2] sm:$0x3] }
  0x2b   :  { %221 = vlog2.f32 %v105_v6  ;;  %v77_v56 = vmul.f32 %v64_v44, %v64_v44  ;;  %v89_v62 = vsub.f32 %v87_v53, %v88_v54 }
  0x2c   :  { %223 = vlog2.f32 %v106_v7  ;;  %v140_v41 = vsub.s32 %v137_v32, %v139_v33 }
  0x31   :  { %v214_v8 = vpop.eup %213 }
  0x32   :  { %v216_v9 = vpop.eup %215 }
  0x33   :  { %v218_v10 = vpop.eup %217  ;;  %v71_v11 = vadd.f32 %v216_v9, %v214_v8 }
  0x34   :  { %v220_v13 = vpop.eup %219  ;;  %v100_v15 = vmul.f32 0.6931472, %v218_v10  ;;  %v90_v10 = vand.u32 2147483647, %v89_v62 }
  0x35   :  { %v222_v19 = vpop.eup %221  ;;  %v72_v20 = vmax.f32 %v71_v11, -2.0  ;;  %v102_v21 = vmul.f32 0.6931472, %v220_v13 }
  0x36   :  { %v224_v22 = vpop.eup %223  ;;  %v103_v23 = vmax.f32 %v100_v15, -100.0  ;;  %v108_v24 = vmul.f32 0.6931472, %v222_v19  ;;  %v91_v16 = vsel %vm80_vm1, %v90_v10, 0.0 }
  0x37   :  { %v73_v26 = vmin.f32 %v72_v20, 20.0  ;;  %v104_v27 = vmax.f32 %v102_v21, -100.0  ;;  %v110_v28 = vmul.f32 0.6931472, %v224_v22 }
  0x38   :  { %v111_v30 = vmax.f32 %v108_v24, -100.0  ;;  %v115_v31 = vmul.f32 %v103_v23, %v95_v12 }
  0x39   :  { %225 = vlog2.f32 %v73_v26  ;;  %v112_v34 = vmax.f32 %v110_v28, -100.0  ;;  %v116_v35 = vmul.f32 %v104_v27, %v96_v14 }
  0x3a   :  { %v119_v36 = vmul.f32 %v117_v25, %v111_v30 }
  0x3b   :  { %v120_v37 = vmul.f32 %v118_v29, %v112_v34 }
  0x3c   :  { %v121_v40 = vadd.f32 %v119_v36, %v115_v31 }
  0x3d   :  { %v122_v42 = vadd.f32 %v120_v37, %v116_v35 }
  0x3e   :  { %v123_v43 = vsub.f32 0.0, %v121_v40 }
  0x3f   :  { %v124_v45 = vsub.f32 0.0, %v122_v42 }
  0x40   :  { %v134_v46 = vcombine.high %v123_v43, %v123_v43  ;;  %v141_v47 = vrot.slane %v123_v43, %v140_v41 }
  0x41   :  { %v151_v48 = vcombine.high %v124_v45, %v124_v45  ;;  %v158_v51 = vrot.slane %v124_v45, %v140_v41 }
  0x42   :  { %v148_v49 = vrot.slane %v134_v46, %v140_v41  ;;  %v149_v50 = vcombine.high %v141_v47, %v141_v47  ;;  %v177_v52 = vsel %vm176_vm0, %v141_v47, 0.0 }
  0x43   :  { %v226_v55 = vpop.eup %225  ;;  %v165_v0 = vrot.slane %v151_v48, %v140_v41  ;;  %v166_v1 = vcombine.high %v158_v51, %v158_v51  ;;  %v184_v5 = vsel %vm176_vm0, %v158_v51, 0.0 }
  0x44   :  { %v75_v57 = vmul.f32 0.6931472, %v226_v55  ;;  %v150_v58 = vcombine.high %v148_v49, %v148_v49  ;;  %v178_v59 = vsel %vm176_vm0, %v149_v50, 0.0  ;;  %v180_v60 = vsel %vm176_vm0, %v148_v49, 0.0 }
  0x45   :  { %v179_v61 = vadd.f32 %v178_v59, %v177_v52  ;;  %v167_v8 = vcombine.high %v165_v0, %v165_v0  ;;  %v186_v9 = vsel %vm176_vm0, %v166_v1, 0.0  ;;  %v188_v13 = vsel %vm176_vm0, %v165_v0, 0.0 }
  0x46   :  { %v76_v63 = vadd.f32 1.0, %v75_v57  ;;  %v182_v2 = vsel %vm176_vm0, %v150_v58, 0.0 }
  0x47   :  { %v181_v3 = vadd.f32 %v180_v60, %v179_v61  ;;  %v190_v15 = vsel %vm176_vm0, %v167_v8, 0.0 }
  0x48   :  { %v78_v4 = vsub.f32 %v76_v63, %v77_v56 }
  0x49   :  { %v183_v6 = vadd.f32 %v182_v2, %v181_v3 }
  0x4a   :  { %v79_v7 = vsub.f32 %v78_v4, %v73_v26 }
  0x4b   :  { %v185_v11 = vadd.f32 %v184_v5, %v183_v6 }
  0x4c   :  { %v81_v12 = vsel %vm80_vm1, %v79_v7, 0.0 }
  0x4d   :  { %82 = vadd.xlane.f32.xlu0 %v81_v12  ;;  %v187_v14 = vadd.f32 %v186_v9, %v185_v11 }
  0x4f   :  { %v189_v17 = vadd.f32 %v188_v13, %v187_v14 }
  0x51   :  { %v191_v18 = vadd.f32 %v190_v15, %v189_v17  ;;  %92 = vadd.xlane.f32.xlu0 %v91_v16 }
  0x53   :  { %192 = vadd.xlane.f32.xlu1 %v191_v18 }
  0xda   :  { %v83_v19 = vpop.xlane.xlu0 %82 }
  0xdb   :  { %v84_v20 = vmul.f32 -0.5, %v83_v19 }
  0xdd   :  { %86 = vst.msk [vmem:[%s401_s9] sm:$0x3] %vm85_vm2, %v84_v20 }
  0xde   :  { %v93_v21 = vpop.xlane.xlu0 %92 }
  0xdf   :  { %94 = vst.msk [vmem:[%s402_s10] sm:$0x3] %vm85_vm2, %v93_v21 }
  0xe0   :  { %v193_v22 = vpop.xlane.xlu1 %192 }
  0xe1   :  { %195 = vst.msk [vmem:[%s400_s8] sm:$0x3] %vm85_vm2, %v193_v22 }
  0xe2   :  { %208 = vsyncpa [#allocation4], 1 }
  0xe3   :  { %209 = vsyncpa [#allocation6], 1 }

</bundles_post_ra>
